<compile_context>
chip_gen: v7x
topology: tpu7x:2x2x1
jax: 0.10.0
libtpu: 0.0.40
codegen_flags: <defaults>
</compile_context>

<pallas_src>
import math

import jax
import jax.numpy as jnp
from jax.experimental import pallas as pl
from jax.experimental.pallas import tpu as pltpu


# ----------------------------------------------------------------------------
# Module arithmetic helpers (mirrors WideLowRankConv3x3.isoflop_width_control)
# ----------------------------------------------------------------------------
def isoflop_width_control(f_in, f_out, width_scaling_factor):
    old_f_in = int(f_in / width_scaling_factor)
    old_f_out = int(f_out / width_scaling_factor)
    expanded = 3 * 3 * old_f_in * old_f_out / (3 * 3 * f_in + f_out)
    return int(math.ceil(expanded))


def _round_up(x, m):
    return ((x + m - 1) // m) * m


# ----------------------------------------------------------------------------
# TPU-generation-aware budgets
# ----------------------------------------------------------------------------
def _vmem_budgets():
    """Returns (per-step tile budget, Mosaic vmem_limit_bytes) per TPU gen."""
    try:
        vmem = int(pltpu.get_tpu_info().vmem_capacity_bytes)
    except Exception:           # CPU / interpret / older JAX: assume 128 MiB
        vmem = 128 << 20
    if vmem <= (64 << 20):      # v7x-class: 64 MiB physical VMEM
        return 4 << 20, 48 << 20
    return 12 << 20, 100 << 20  # v5e / v6e: 128 MiB physical VMEM


def _compiler_params(dim_sem):
    _, vmem_limit = _vmem_budgets()
    return pltpu.CompilerParams(dimension_semantics=dim_sem,
                                vmem_limit_bytes=vmem_limit)


# Single-buffer grid-invariant operands (weights / BN affines) when supported.
try:
    _SINGLE_BUF = pl.Buffered(1)
except Exception:  # pragma: no cover
    _SINGLE_BUF = None


def _const_spec(block_shape, index_map):
    if _SINGLE_BUF is not None:
        try:
            return pl.BlockSpec(block_shape, index_map, pipeline_mode=_SINGLE_BUF)
        except TypeError:
            pass
    return pl.BlockSpec(block_shape, index_map)


# ----------------------------------------------------------------------------
# Kernels
# ----------------------------------------------------------------------------
def _nine_tap_matmul(xp_ref, u_ref, hout, wout, cin):
    """sum over 3x3 taps of (shifted-activation @ U_tap), no im2col in HBM."""
    hw = hout * wout
    acc = jnp.zeros((hw, u_ref.shape[-1]), jnp.float32)
    for kh in range(3):
        for kw in range(3):
            p = xp_ref[kh:kh + hout, kw:kw + wout, :].reshape(hw, cin)
            acc = acc + jnp.dot(p, u_ref[kh * 3 + kw],
                                preferred_element_type=jnp.float32)
    return acc


def _make_fused_conv_bn_relu_kernel(hout, wout, cin):
    # conv1 (stride 1): (patches @ U) @ V, bn affine, relu.
    def kernel(xp_ref, u_ref, v_ref, scale_ref, shift_ref, o_ref):
        acc = _nine_tap_matmul(xp_ref, u_ref, hout, wout, cin)
        y = jnp.dot(acc.astype(jnp.bfloat16), v_ref[...],
                    preferred_element_type=jnp.float32)
        y = y * scale_ref[...] + shift_ref[...]
        o_ref[...] = jnp.maximum(y, 0.0).astype(o_ref.dtype)
    return kernel


def _make_fused_conv2_id_kernel(hout, wout, cin):
    # conv2 + bn2 + identity residual + relu.
    def kernel(xp_ref, u_ref, v_ref, scale_ref, shift_ref, sc_ref, o_ref):
        acc = _nine_tap_matmul(xp_ref, u_ref, hout, wout, cin)
        y = jnp.dot(acc.astype(jnp.bfloat16), v_ref[...],
                    preferred_element_type=jnp.float32)
        y = y * scale_ref[...] + shift_ref[...]
        y = y + sc_ref[...].astype(jnp.float32)
        o_ref[...] = jnp.maximum(y, 0.0).astype(o_ref.dtype)
    return kernel


def _make_fused_conv2_proj_kernel(hout, wout, cin):
    # conv2 + bn2 + fused 1x1 projection shortcut (xs @ Ws, bn_s) + add + relu.
    def kernel(xp_ref, u_ref, v_ref, scale_ref, shift_ref,
               xs_ref, ws_ref, sscale_ref, sshift_ref, o_ref):
        acc = _nine_tap_matmul(xp_ref, u_ref, hout, wout, cin)
        y = jnp.dot(acc.astype(jnp.bfloat16), v_ref[...],
                    preferred_element_type=jnp.float32)
        y = y * scale_ref[...] + shift_ref[...]
        sc = jnp.dot(xs_ref[...], ws_ref[...], preferred_element_type=jnp.float32)
        sc = sc * sscale_ref[...] + sshift_ref[...]
        o_ref[...] = jnp.maximum(y + sc, 0.0).astype(o_ref.dtype)
    return kernel


def _im2col_conv_bn_relu_kernel(p_ref, u_ref, v_ref, scale_ref, shift_ref, o_ref):
    # Fallback for the stride-2 conv1 (patches precomputed by XLA im2col).
    t = jnp.dot(p_ref[...], u_ref[...], preferred_element_type=jnp.float32)
    y = jnp.dot(t.astype(jnp.bfloat16), v_ref[...],
                preferred_element_type=jnp.float32)
    y = y * scale_ref[...] + shift_ref[...]
    o_ref[...] = jnp.maximum(y, 0.0).astype(o_ref.dtype)


# ----------------------------------------------------------------------------
# pallas_call wrappers
# ----------------------------------------------------------------------------
def _fused_conv_bn_relu(xp, u9, v, scale, shift):
    n, hp, wp, cin = xp.shape
    hout, wout = hp - 2, wp - 2
    hw = hout * wout
    ep, cout = v.shape
    flops = 2 * n * hw * (9 * cin * ep + ep * cout)
    bytes_acc = (xp.nbytes + u9.nbytes + v.nbytes + scale.nbytes + shift.nbytes
                 + n * hw * cout * 2)
    return pl.pallas_call(
        _make_fused_conv_bn_relu_kernel(hout, wout, cin),
        out_shape=jax.ShapeDtypeStruct((n, hw, cout), jnp.bfloat16),
        grid=(n,),
        in_specs=[
            pl.BlockSpec((None, hp, wp, cin), lambda b: (b, 0, 0, 0)),
            _const_spec((9, cin, ep), lambda b: (0, 0, 0)),
            _const_spec((ep, cout), lambda b: (0, 0)),
            _const_spec((1, cout), lambda b: (0, 0)),
            _const_spec((1, cout), lambda b: (0, 0)),
        ],
        out_specs=pl.BlockSpec((None, hw, cout), lambda b: (b, 0, 0)),
        compiler_params=_compiler_params(("parallel",)),
        cost_estimate=pl.CostEstimate(flops=int(flops), transcendentals=0,
                                      bytes_accessed=int(bytes_acc)),
    )(xp, u9, v, scale, shift)


def _fused_conv2_id(xp, u9, v, scale, shift, sc):
    n, hp, wp, cin = xp.shape
    hout, wout = hp - 2, wp - 2
    hw = hout * wout
    ep, cout = v.shape
    flops = 2 * n * hw * (9 * cin * ep + ep * cout)
    bytes_acc = (xp.nbytes + sc.nbytes + u9.nbytes + v.nbytes
                 + scale.nbytes + shift.nbytes + n * hw * cout * 2)
    return pl.pallas_call(
        _make_fused_conv2_id_kernel(hout, wout, cin),
        out_shape=jax.ShapeDtypeStruct((n, hw, cout), jnp.bfloat16),
        grid=(n,),
        in_specs=[
            pl.BlockSpec((None, hp, wp, cin), lambda b: (b, 0, 0, 0)),
            _const_spec((9, cin, ep), lambda b: (0, 0, 0)),
            _const_spec((ep, cout), lambda b: (0, 0)),
            _const_spec((1, cout), lambda b: (0, 0)),
            _const_spec((1, cout), lambda b: (0, 0)),
            pl.BlockSpec((None, hw, cout), lambda b: (b, 0, 0)),
        ],
        out_specs=pl.BlockSpec((None, hw, cout), lambda b: (b, 0, 0)),
        compiler_params=_compiler_params(("parallel",)),
        cost_estimate=pl.CostEstimate(flops=int(flops), transcendentals=0,
                                      bytes_accessed=int(bytes_acc)),
    )(xp, u9, v, scale, shift, sc)


def _fused_conv2_proj(xp, u9, v, scale, shift, xs, ws, sscale, sshift):
    n, hp, wp, cin = xp.shape
    hout, wout = hp - 2, wp - 2
    hw = hout * wout
    ep, cout = v.shape
    cin_x = xs.shape[-1]
    flops = 2 * n * hw * (9 * cin * ep + ep * cout + cin_x * cout)
    bytes_acc = (xp.nbytes + xs.nbytes + u9.nbytes + v.nbytes + ws.nbytes
                 + scale.nbytes + shift.nbytes + sscale.nbytes + sshift.nbytes
                 + n * hw * cout * 2)
    return pl.pallas_call(
        _make_fused_conv2_proj_kernel(hout, wout, cin),
        out_shape=jax.ShapeDtypeStruct((n, hw, cout), jnp.bfloat16),
        grid=(n,),
        in_specs=[
            pl.BlockSpec((None, hp, wp, cin), lambda b: (b, 0, 0, 0)),
            _const_spec((9, cin, ep), lambda b: (0, 0, 0)),
            _const_spec((ep, cout), lambda b: (0, 0)),
            _const_spec((1, cout), lambda b: (0, 0)),
            _const_spec((1, cout), lambda b: (0, 0)),
            pl.BlockSpec((None, hw, cin_x), lambda b: (b, 0, 0)),
            _const_spec((cin_x, cout), lambda b: (0, 0)),
            _const_spec((1, cout), lambda b: (0, 0)),
            _const_spec((1, cout), lambda b: (0, 0)),
        ],
        out_specs=pl.BlockSpec((None, hw, cout), lambda b: (b, 0, 0)),
        compiler_params=_compiler_params(("parallel",)),
        cost_estimate=pl.CostEstimate(flops=int(flops), transcendentals=0,
                                      bytes_accessed=int(bytes_acc)),
    )(xp, u9, v, scale, shift, xs, ws, sscale, sshift)


def _pick_tile_m(hw, row_bytes, n_batch):
    """Largest multiple-of-8 divisor of hw within the per-step VMEM budget,
    while keeping >= ~8 total grid steps (megacore + pipelining)."""
    budget, _ = _vmem_budgets()
    min_steps = max(1, -(-8 // max(n_batch, 1)))
    divisors = [d for d in range(8, hw + 1, 8) if hw % d == 0]
    fitting = [d for d in divisors if d * row_bytes <= budget]
    preferred = [d for d in fitting if hw // d >= min_steps]
    if preferred:
        return max(preferred)
    if fitting:
        return max(fitting)
    return hw  # no multiple-of-8 divisor: full-extent block (always legal)


def _im2col_conv_bn_relu(patches, u, v, scale, shift):
    n, hw, kc = patches.shape
    ep = u.shape[1]
    cout = v.shape[1]
    # double-buffered patch tile + output tile per row
    tm = _pick_tile_m(hw, 2 * (kc + cout) * patches.dtype.itemsize, n)
    flops = 2 * n * hw * (kc * ep + ep * cout)
    bytes_acc = (patches.nbytes + u.nbytes + v.nbytes + scale.nbytes
                 + shift.nbytes + n * hw * cout * 2)
    return pl.pallas_call(
        _im2col_conv_bn_relu_kernel,
        out_shape=jax.ShapeDtypeStruct((n, hw, cout), jnp.bfloat16),
        grid=(n, hw // tm),
        in_specs=[
            pl.BlockSpec((None, tm, kc), lambda b, t: (b, t, 0)),
            _const_spec((kc, ep), lambda b, t: (0, 0)),
            _const_spec((ep, cout), lambda b, t: (0, 0)),
            _const_spec((1, cout), lambda b, t: (0, 0)),
            _const_spec((1, cout), lambda b, t: (0, 0)),
        ],
        out_specs=pl.BlockSpec((None, tm, cout), lambda b, t: (b, t, 0)),
        compiler_params=_compiler_params(("parallel", "parallel")),
        cost_estimate=pl.CostEstimate(flops=int(flops), transcendentals=0,
                                      bytes_accessed=int(bytes_acc)),
    )(patches, u, v, scale, shift)


# ----------------------------------------------------------------------------
# Glue: padding / im2col (pure data movement, plain JAX, bf16)
# ----------------------------------------------------------------------------
def _pad_hw(x_nhwc):
    return jnp.pad(x_nhwc, ((0, 0), (1, 1), (1, 1), (0, 0)))


def _im2col_3x3(x_nhwc, stride):
    """3x3/pad=1/strided im2col -> (N, Hout*Wout, 9*C), tap order (kh, kw, c)."""
    n, h, w, c = x_nhwc.shape
    xp = _pad_hw(x_nhwc)
    hout = (h + 2 - 3) // stride + 1
    wout = (w + 2 - 3) // stride + 1
    cols = []
    for kh in range(3):
        for kw in range(3):
            cols.append(xp[:, kh:kh + stride * (hout - 1) + 1:stride,
                              kw:kw + stride * (wout - 1) + 1:stride, :])
    patches = jnp.concatenate(cols, axis=-1)
    return patches.reshape(n, hout * wout, 9 * c), hout, wout


def _prep_uv(u_mat, v_mat, cin):
    """Zero-pad E to a lane multiple (bit-identical), cast to bf16.
    Returns (U flat (9*Cin, Ep), U per-tap (9, Cin, Ep), V (Ep, Cout))."""
    e = u_mat.shape[1]
    ep = _round_up(e, 128)  # TODO(synk): pad to 256 on v6e/v7x when E > 128
    u_p = jnp.pad(u_mat, ((0, 0), (0, ep - e))).astype(jnp.bfloat16)
    v_p = jnp.pad(v_mat, ((0, ep - e), (0, 0))).astype(jnp.bfloat16)
    return u_p, u_p.reshape(9, cin, ep), v_p


# ----------------------------------------------------------------------------
# Parameter init (deterministic, shapes follow the PyTorch module)
# ----------------------------------------------------------------------------
def init_block_params(key, f_in, f_out, downsample, width_scaling_factor):
    stride = 2 if downsample else 1
    e1 = isoflop_width_control(f_in, f_out, width_scaling_factor)
    e2 = isoflop_width_control(f_out, f_out, width_scaling_factor)
    keys = jax.random.split(key, 8)

    def kaiming_out(k, shape, fan_out):
        return jax.random.normal(k, shape, jnp.float32) * jnp.sqrt(2.0 / fan_out)

    # torch U_conv3x3 weight (E, Cin, 3, 3) stored matmul-ready (kh,kw,Cin,E)
    u1 = kaiming_out(keys[0], (3, 3, f_in, e1), fan_out=e1 * 9).reshape(9 * f_in, e1)
    v1 = kaiming_out(keys[1], (e1, f_out), fan_out=f_out)
    u2 = kaiming_out(keys[2], (3, 3, f_out, e2), fan_out=e2 * 9).reshape(9 * f_out, e2)
    v2 = kaiming_out(keys[3], (e2, f_out), fan_out=f_out)

    def bn_fold(k, c):
        kg, kb, km, kv = jax.random.split(k, 4)
        gamma = 1.0 + 0.1 * jax.random.normal(kg, (c,), jnp.float32)
        beta = 0.1 * jax.random.normal(kb, (c,), jnp.float32)
        mean = 0.1 * jax.random.normal(km, (c,), jnp.float32)
        var = 1.0 + 0.1 * jax.random.uniform(kv, (c,), jnp.float32)
        scale = gamma / jnp.sqrt(var + 1e-5)
        shift = beta - mean * scale
        return scale.reshape(1, c), shift.reshape(1, c)

    bn1_scale, bn1_shift = bn_fold(keys[4], f_out)
    bn2_scale, bn2_shift = bn_fold(keys[5], f_out)

    params = dict(stride=stride, f_in=f_in, f_out=f_out,
                  U1=u1, V1=v1, U2=u2, V2=v2,
                  bn1_scale=bn1_scale, bn1_shift=bn1_shift,
                  bn2_scale=bn2_scale, bn2_shift=bn2_shift,
                  has_shortcut=bool(downsample or f_in != f_out))
    if params["has_shortcut"]:
        ws = kaiming_out(keys[6], (f_in, f_out), fan_out=f_out)
        bns_scale, bns_shift = bn_fold(keys[7], f_out)
        params.update(Ws=ws, bns_scale=bns_scale, bns_shift=bns_shift)
    return params


# ----------------------------------------------------------------------------
# Block forward (mirrors BlockISOFlopWideFactorized.forward, inference BN)
# ----------------------------------------------------------------------------
def block_forward(params, x_nchw):
    # Boundary layout change in bf16 (halves its HBM traffic).
    x_bf = jnp.transpose(x_nchw.astype(jnp.bfloat16), (0, 2, 3, 1))  # NCHW->NHWC
    n, h, w, cin = x_bf.shape
    stride = params["stride"]
    cout = params["V1"].shape[1]

    u1_flat, u1_taps, v1 = _prep_uv(params["U1"], params["V1"], cin)
    _, u2_taps, v2 = _prep_uv(params["U2"], params["V2"], cout)

    # conv1: U_conv3x3 (stride) -> V_conv1x1 -> bn1 -> relu (one kernel).
    if stride == 1:
        h1 = _fused_conv_bn_relu(_pad_hw(x_bf), u1_taps, v1,
                                 params["bn1_scale"], params["bn1_shift"])
        h1o, w1o = h, w
    else:
        # TODO(synk): stride-2 conv1 still materializes im2col patches in HBM.
        p1, h1o, w1o = _im2col_3x3(x_bf, stride)
        h1 = _im2col_conv_bn_relu(p1, u1_flat, v1,
                                  params["bn1_scale"], params["bn1_shift"])
    h1_img = h1.reshape(n, h1o, w1o, cout)

    # conv2 (stride 1) + bn2 + residual/shortcut + relu, one fused kernel.
    h1_pad = _pad_hw(h1_img)
    if params["has_shortcut"]:
        # NOTE: the PyTorch module hardcodes stride=2 on the projection
        # shortcut, which is only shape-consistent when downsample=True.
        # We use the block stride so both paths always agree spatially
        # (identical to PyTorch in every valid configuration).
        xs = x_bf[:, ::stride, ::stride, :].reshape(n, h1o * w1o, cin)
        out = _fused_conv2_proj(h1_pad, u2_taps, v2,
                                params["bn2_scale"], params["bn2_shift"],
                                xs, params["Ws"].astype(jnp.bfloat16),
                                params["bns_scale"], params["bns_shift"])
    else:
        sc = x_bf.reshape(n, h1o * w1o, cin)            # identity residual (bf16)
        out = _fused_conv2_id(h1_pad, u2_taps, v2,
                              params["bn2_scale"], params["bn2_shift"], sc)

    out_nhwc = out.reshape(n, h1o, w1o, cout)
    return jnp.transpose(out_nhwc, (0, 3, 1, 2))        # back to NCHW (bf16)


def compute_weight_norm(u_mat, v_mat, f_in):
    # Side effect of WideLowRankConv3x3.forward when uv_layer == 'linear'.
    e = u_mat.shape[1]
    u_t = jnp.transpose(u_mat.reshape(3, 3, f_in, e), (3, 2, 0, 1)).reshape(e, -1)
    return jnp.sum((v_mat.T @ u_t) ** 2)


# ----------------------------------------------------------------------------
# Pure-JAX reference (lax convs, f32 HIGHEST) for the correctness check
# ----------------------------------------------------------------------------
def reference_forward(params, x_nchw):
    x = x_nchw.astype(jnp.float32)
    f_in, f_out = params["f_in"], params["f_out"]
    e1, e2 = params["U1"].shape[1], params["U2"].shape[1]
    u1 = jnp.transpose(params["U1"].reshape(3, 3, f_in, e1), (3, 2, 0, 1))
    v1 = params["V1"].T[:, :, None, None]
    u2 = jnp.transpose(params["U2"].reshape(3, 3, f_out, e2), (3, 2, 0, 1))
    v2 = params["V2"].T[:, :, None, None]

    def conv(x, w, stride, padding):
        return jax.lax.conv_general_dilated(
            x, w, (stride, stride), padding,
            dimension_numbers=("NCHW", "OIHW", "NCHW"),
            precision=jax.lax.Precision.HIGHEST)

    def bn(x, scale, shift):
        return x * scale.reshape(1, -1, 1, 1) + shift.reshape(1, -1, 1, 1)

    out = conv(x, u1, params["stride"], [(1, 1), (1, 1)])
    out = conv(out, v1, 1, [(0, 0), (0, 0)])
    out = jax.nn.relu(bn(out, params["bn1_scale"], params["bn1_shift"]))
    out2 = conv(out, u2, 1, [(1, 1), (1, 1)])
    out2 = conv(out2, v2, 1, [(0, 0), (0, 0)])
    out2 = bn(out2, params["bn2_scale"], params["bn2_shift"])
    if params["has_shortcut"]:
        ws = params["Ws"].T[:, :, None, None]
        sc = bn(conv(x, ws, params["stride"], [(0, 0), (0, 0)]),
                params["bns_scale"], params["bns_shift"])
    else:
        sc = x
    return jax.nn.relu(out2 + sc)


if __name__ == "__main__":
    key = jax.random.PRNGKey(0)

    def run_and_check(k, n, f_in, f_out, h, w, downsample, wsf, expect_hw):
        k_x, k_p = jax.random.split(k)
        x = jax.random.normal(k_x, (n, f_in, h, w), jnp.float32)  # NCHW like PyTorch
        params = init_block_params(k_p, f_in, f_out, downsample, wsf)

        out = jax.block_until_ready(block_forward(params, x))

        # Mirror the compute_weight_norm() side effect of the 'linear' uv_layer.
        _ = jax.block_until_ready(compute_weight_norm(params["U1"], params["V1"], f_in))
        _ = jax.block_until_ready(compute_weight_norm(params["U2"], params["V2"], f_out))

        ref = reference_forward(params, x)
        assert out.shape == ref.shape == (n, f_out) + expect_hw, (out.shape, ref.shape)
        err = float(jnp.max(jnp.abs(out.astype(jnp.float32) - ref)))
        ref_scale = float(jnp.max(jnp.abs(ref)))
        # Full-bf16 inference path (bf16 activations/weights/residual/output,
        # f32 MXU accumulation, bf16 inter-matmul intermediate) vs an f32
        # HIGHEST-precision reference: check error relative to output scale.
        assert err <= 0.03 * ref_scale + 1e-3, (err, ref_scale)

    k1, k2 = jax.random.split(key)
    # Downsampling block with projection shortcut (width_scaling_factor=0.5).
    run_and_check(k1, n=2, f_in=4, f_out=8, h=16, w=16,
                  downsample=True, wsf=0.5, expect_hw=(8, 8))
    # Identity-shortcut block (f_in == f_out, no downsample).
    run_and_check(k2, n=2, f_in=8, f_out=8, h=16, w=16,
                  downsample=False, wsf=0.5, expect_hw=(16, 16))

    print("KERNEL_OK")
</pallas_src>

<mosaic_0001>
module attributes {stable_mosaic.version = 11 : i64} {
  func.func @_im2col_conv_bn_relu_kernel(%arg0: i32, %arg1: i32, %arg2: memref<1x16x36xbf16, #tpu.memory_space<vmem>>, %arg3: memref<36x128xbf16, #tpu.memory_space<vmem>>, %arg4: memref<128x8xbf16, #tpu.memory_space<vmem>>, %arg5: memref<1x8xf32, #tpu.memory_space<vmem>>, %arg6: memref<1x8xf32, #tpu.memory_space<vmem>>, %arg7: memref<1x16x8xbf16, #tpu.memory_space<vmem>>) attributes {dimension_semantics = [#tpu.dimension_semantics<parallel>, #tpu.dimension_semantics<parallel>], iteration_bounds = array<i64: 2, 4>, scalar_prefetch = 0 : i64, scratch_operands = 0 : i64, tpu.core_type = #tpu.core_type<tc>, window_params = [{transform_indices = @transform_0, window_bounds = array<i64: 1, 16, 36>}, {pipeline_mode = #tpu.pipeline_mode<synchronous>, transform_indices = @transform_1, window_bounds = array<i64: 36, 128>}, {pipeline_mode = #tpu.pipeline_mode<synchronous>, transform_indices = @transform_2, window_bounds = array<i64: 128, 8>}, {pipeline_mode = #tpu.pipeline_mode<synchronous>, transform_indices = @transform_3, window_bounds = array<i64: 1, 8>}, {pipeline_mode = #tpu.pipeline_mode<synchronous>, transform_indices = @transform_4, window_bounds = array<i64: 1, 8>}, {transform_indices = @transform_5, window_bounds = array<i64: 1, 16, 8>}]} {
    %c0 = arith.constant 0 : index
    %c0_0 = arith.constant 0 : index
    %c0_1 = arith.constant 0 : index
    %0 = vector.load %arg2[%c0, %c0_0, %c0_1] : memref<1x16x36xbf16, #tpu.memory_space<vmem>>, vector<1x16x36xbf16>
    %1 = vector.shape_cast %0 : vector<1x16x36xbf16> to vector<16x36xbf16>
    %c0_2 = arith.constant 0 : index
    %c0_3 = arith.constant 0 : index
    %2 = vector.load %arg3[%c0_2, %c0_3] : memref<36x128xbf16, #tpu.memory_space<vmem>>, vector<36x128xbf16>
    %cst = arith.constant dense<0.000000e+00> : vector<16x128xf32>
    %3 = tpu.matmul %1, %2, %cst {dimension_numbers = #tpu.dot_dimension_numbers<[1], [0], [0], [1], [0, 0, 1, 1], [], []>} : vector<16x36xbf16>, vector<36x128xbf16>, vector<16x128xf32> -> vector<16x128xf32>
    %4 = arith.truncf %3 : vector<16x128xf32> to vector<16x128xbf16>
    %c0_4 = arith.constant 0 : index
    %c0_5 = arith.constant 0 : index
    %5 = vector.load %arg4[%c0_4, %c0_5] : memref<128x8xbf16, #tpu.memory_space<vmem>>, vector<128x8xbf16>
    %cst_6 = arith.constant dense<0.000000e+00> : vector<16x8xf32>
    %6 = tpu.matmul %4, %5, %cst_6 {dimension_numbers = #tpu.dot_dimension_numbers<[1], [0], [0], [1], [0, 0, 1, 1], [], []>} : vector<16x128xbf16>, vector<128x8xbf16>, vector<16x8xf32> -> vector<16x8xf32>
    %c0_7 = arith.constant 0 : index
    %c0_8 = arith.constant 0 : index
    %7 = vector.load %arg5[%c0_7, %c0_8] : memref<1x8xf32, #tpu.memory_space<vmem>>, vector<1x8xf32>
    %8 = vector.broadcast %7 : vector<1x8xf32> to vector<16x8xf32>
    %9 = arith.mulf %6, %8 : vector<16x8xf32>
    %c0_9 = arith.constant 0 : index
    %c0_10 = arith.constant 0 : index
    %10 = vector.load %arg6[%c0_9, %c0_10] : memref<1x8xf32, #tpu.memory_space<vmem>>, vector<1x8xf32>
    %11 = vector.broadcast %10 : vector<1x8xf32> to vector<16x8xf32>
    %12 = arith.addf %9, %11 : vector<16x8xf32>
    %cst_11 = arith.constant 0.000000e+00 : f32
    %13 = vector.broadcast %cst_11 : f32 to vector<16x8xf32>
    %14 = arith.maximumf %12, %13 : vector<16x8xf32>
    %15 = arith.truncf %14 : vector<16x8xf32> to vector<16x8xbf16>
    %c0_12 = arith.constant 0 : index
    %c0_13 = arith.constant 0 : index
    %c0_14 = arith.constant 0 : index
    %16 = vector.load %arg7[%c0_12, %c0_13, %c0_14] : memref<1x16x8xbf16, #tpu.memory_space<vmem>>, vector<1x16x8xbf16>
    %17 = vector.shape_cast %16 : vector<1x16x8xbf16> to vector<16x8xbf16>
    %18 = vector.shape_cast %15 : vector<16x8xbf16> to vector<1x16x8xbf16>
    tpu.vector_store %arg7[%c0_12, %c0_13, %c0_14], %18 {strides = array<i32>} : memref<1x16x8xbf16, #tpu.memory_space<vmem>>, vector<1x16x8xbf16>,
    return
  }
  func.func @transform_0(%arg0: i32, %arg1: i32) -> (i32, i32, i32) {
    %c0_i32 = arith.constant 0 : i32
    %c0_i32_0 = arith.constant 0 : i32
    return %arg0, %arg1, %c0_i32 : i32, i32, i32
  }
  func.func @transform_1(%arg0: i32, %arg1: i32) -> (i32, i32) {
    %c0_i32 = arith.constant 0 : i32
    %c0_i32_0 = arith.constant 0 : i32
    %c0_i32_1 = arith.constant 0 : i32
    return %c0_i32, %c0_i32_0 : i32, i32
  }
  func.func @transform_2(%arg0: i32, %arg1: i32) -> (i32, i32) {
    %c0_i32 = arith.constant 0 : i32
    %c0_i32_0 = arith.constant 0 : i32
    %c0_i32_1 = arith.constant 0 : i32
    return %c0_i32, %c0_i32_0 : i32, i32
  }
  func.func @transform_3(%arg0: i32, %arg1: i32) -> (i32, i32) {
    %c0_i32 = arith.constant 0 : i32
    %c0_i32_0 = arith.constant 0 : i32
    %c0_i32_1 = arith.constant 0 : i32
    return %c0_i32, %c0_i32_0 : i32, i32
  }
  func.func @transform_4(%arg0: i32, %arg1: i32) -> (i32, i32) {
    %c0_i32 = arith.constant 0 : i32
    %c0_i32_0 = arith.constant 0 : i32
    %c0_i32_1 = arith.constant 0 : i32
    return %c0_i32, %c0_i32_0 : i32, i32
  }
  func.func @transform_5(%arg0: i32, %arg1: i32) -> (i32, i32, i32) {
    %c0_i32 = arith.constant 0 : i32
    %c0_i32_0 = arith.constant 0 : i32
    return %arg0, %arg1, %c0_i32 : i32, i32, i32
  }
}

</mosaic_0001>

<bundles_post_ra>
// kernel: tpu_custom_call.1
= control target key start
LH: loop header
LB: loop body
LE: loop exit
PB: predicated region body
PF: predicated region fallthrough
CT: control target
= control target key end

     0   :  { %s1531_s0 = inlined_call_operand.hbm [shape: bf16[2,64,36], index: 0, kind: input, shape index: {}]   ;;  %s1532_s1 = inlined_call_operand.hbm [shape: bf16[36,128], index: 1, kind: input, shape index: {}]   ;;  %s1533_s2 = inlined_call_operand.hbm [shape: bf16[128,8], index: 2, kind: input, shape index: {}]   ;;  %s1534_s3 = inlined_call_operand.hbm [shape: f32[1,8], index: 3, kind: input, shape index: {}]   ;;  %s1535_s4 = inlined_call_operand.hbm [shape: f32[1,8], index: 4, kind: input, shape index: {}]   ;;  %s1536_s5 = inlined_call_operand.hbm [shape: bf16[2,64,8], index: 5, kind: output, shape index: {}]  }
   0x1   :  { %1546 = sst [smem:[#allocation19_spill]] %s1532_s1 }
   0x2   :  { %1547 = sst [smem:[#allocation20_spill]] %s1533_s2 }
   0x3   :  { %1548 = sst [smem:[#allocation21_spill]] %s1534_s3 }
   0x4   :  { %1549 = sst [smem:[#allocation22_spill]] %s1536_s5 }
   0x5   :  { %10 = vsyncpa [#allocation3], 0 }
   0x6   :  { %12 = vsyncpa [#allocation3 + $0x1], 0 }
   0x7   :  { %13 = vsyncpa [#allocation6], 0 }
   0x8   :  { %14 = vsyncpa [#allocation9], 0 }
   0x9   :  { %15 = vsyncpa [#allocation4], 0 }
   0xa   :  { %17 = vsyncpa [#allocation4 + $0x1], 0  ;;  %s1191_s18 = smov 0   ;;  %s1193_s19 = smov 0  }
   0xb   :  { %s1195_s20 = smov 0   ;;  %s1197_s21 = smov 0  }
   0xc   :  { %s1199_s22 = smov 0   ;;  %s1201_s23 = smov 0  }
   0xd   :  { %s1203_s24 = smov 0   ;;  %s1205_s25 = smov 0  }
   0xe LB: > { %1550 = sst [smem:[#allocation16_spill]] %s1119_s18  ;;  %s675_s26 = sadd.s32 4294967295, %s1147_s25   ;;  %s1147_s25 = sphi %s1205_s25, %s23_s25   ;;  %s1143_s24 = sphi %s1203_s24, %s1583_s24   ;;  %s1139_s23 = sphi %s1201_s23, %s1582_s23   ;;  %s1135_s22 = sphi %s1199_s22, %s1581_s22   ;;  %s1131_s21 = sphi %s1197_s21, %s1580_s21   ;;  %s1127_s20 = sphi %s1195_s20, %s1579_s20   ;;  %s1123_s19 = sphi %s1193_s19, %s1578_s19   ;;  %s1119_s18 = sphi %s1191_s18, %s1577_s18  }
   0xf   : > { %1551 = sst [smem:[#allocation17_spill]] %s1135_s22  ;;  %s676_s27 = sadd.s32 4294967294, %s1147_s25  }
  0x10   : > { %p57_p0 = scmp.ne.s32.totalorder %s1123_s19, %s1119_s18  ;;  %p1235_p1 = scmp.eq.s32.totalorder %s675_s26, 0 }
  0x11   : > { %p1239_p2 = scmp.eq.s32.totalorder %s675_s26, 7  ;;  %p173_p3 = scmp.eq.s32.totalorder %s676_s27, 7 }
  0x12   : > { %s1552_s28 = scalar_select %p1235_p1, 1, 0 }
  0x13   : > { %s1553_s29 = scalar_select %p1239_p2, 1, 0 }
  0x14   : > { %p1245_p4 = por %p1235_p1, %p57_p0  ;;  %p677_p5 = scmp.ge.s32.totalorder %s1147_s25, 1 }
  0x15   : > { %p1250_p6 = por %p173_p3, %p57_p0  ;;  %p180_p7 = scmp.lt.s32.totalorder %s1147_s25, 9 }
  0x16   : > { %s1554_s30 = scalar_select %p1245_p4, 1, 0 }
  0x17   : > { %s1555_s6 = scalar_select %p1250_p6, 1, 0 }
  0x18   : > { %p1255_p8 = pnand %p677_p5, %p180_p7  ;;  %s1149_s8 = smov [#allocation5]  }
  0x19   : > { %1556 = sst [smem:[#allocation18_spill]] %s1555_s6  ;;  %s192_s9 = sshll.u32 %s1149_s8, 4  ;;  %s1259_s9 = int_to_ptr.vmem [resolvable:$true] %s192_s9 }
  0x1a   : > { %s1557_s7 = scalar_select %p1255_p8, 1, 0 }
  0x1b   : > { %p782_p9 = pneg %p1255_p8  ;;  %s1150_s11 = smov [#allocation8]  }
  0x1c   : > { %s219_s12 = sshll.u32 %s1150_s11, 4  ;;  %s1151_s13 = smov [#allocation7]   ;;  %s1269_s12 = int_to_ptr.vmem [resolvable:$true] %s219_s12 }
  0x1d   : > { %p1265_p10 = pnand %p782_p9, %p1235_p1  ;;  %s1271_s14 = sshll.u32 %s1151_s13, 4  ;;  %s206_s14 = int_to_ptr.vmem [resolvable:$true] %s1271_s14 }
  0x1e   : > { %s1559_s1 = sld [smem:[#allocation19_spill]] }
  0x1f   : > { %p1281_p12 = pneg %p1265_p10 }
  0x24   : > { %s899_s17 = scalar_lea.hbm %s1559_s1, 320 }
  0x25   : > { %p900_p11 = scmp.ne.s32.totalorder %s1559_s1, %s899_s17  ;;  %p906_p3 = scmp.lt.u32.totalorder %s899_s17, %s1559_s1 }
  0x27   : > { %p902_p13 = pnand %p1281_p12, %p900_p11 }
  0x29   : > { %p903_p0 = pneg %p902_p13 }
  0x2b   : > { %p908_p5 = pnand %p906_p3, %p903_p0 }
  0x2d   : > { %911 = shalt.err (!%p908_p5)
}
  0x2e   : > { %s912_s15 = scalar_lea.vmem %s1259_s9, 320  ;;  %p920_p1 = scmp.lt.s32.totalorder %s1259_s9, %s1259_s9 }
  0x2f   : > { %p913_p7 = scmp.ne.s32.totalorder %s1259_s9, %s912_s15  ;;  %p921_p4 = scmp.lt.s32.totalorder %s912_s15, %s912_s15 }
  0x31   : > { %p915_p9 = pnand %p913_p7, %p1281_p12  ;;  %p922_p11 = por %p921_p4, %p920_p1 }
  0x33   : > { %p916_p6 = pneg %p915_p9 }
  0x35   : > { %p923_p13 = pnand %p922_p11, %p916_p6 }
  0x37   : > { %926 = shalt.err (!%p923_p13)
}
  0x38   : > { %s1544_s16 = smov 64   ;;  %s1545_s17 = smov 4  }
  0x39   : > { %785 = dma.hbm_to_vmem [thread:$0]  (!%p1265_p10), %s1559_s1, 320, %s1259_s9, [#allocation6], %s1544_s16, %s1544_s16, %s1545_s17  }
  0x3a   : > { %s1561_s3 = sld [smem:[#allocation21_spill]] }
  0x40   : > { %s927_s15 = scalar_lea.hbm %s1561_s3, 16 }
  0x41   : > { %p928_p1 = scmp.ne.s32.totalorder %s1561_s3, %s927_s15  ;;  %p934_p0 = scmp.lt.u32.totalorder %s927_s15, %s1561_s3 }
  0x43   : > { %p930_p4 = pnand %p928_p1, %p1281_p12 }
  0x45   : > { %p931_p6 = pneg %p930_p4 }
  0x47   : > { %p936_p3 = pnand %p934_p0, %p931_p6 }
  0x49   : > { %939 = shalt.err (!%p936_p3)
}
  0x4a   : > { %s940_s9 = scalar_lea.vmem %s1269_s12, 16  ;;  %s947_s18 = scalar_lea.vmem %s1269_s12, 32 }
  0x4b   : > { %p941_p5 = scmp.ne.s32.totalorder %s1269_s12, %s940_s9  ;;  %p948_p11 = scmp.lt.s32.totalorder %s1269_s12, %s1269_s12 }
  0x4c   : > { %p949_p13 = scmp.lt.s32.totalorder %s947_s18, %s940_s9 }
  0x4d   : > { %p943_p7 = pnand %p941_p5, %p1281_p12 }
  0x4e   : > { %p950_p1 = por %p949_p13, %p948_p11 }
  0x4f   : > { %p944_p9 = pneg %p943_p7 }
  0x51   : > { %p951_p4 = pnand %p950_p1, %p944_p9 }
  0x53   : > { %954 = shalt.err (!%p951_p4)
}
  0x54   : > { %791 = dma.hbm_to_vmem [thread:$0]  (!%p1265_p10), %s1561_s3, 16, %s1269_s12, [#allocation9]  }
  0x55   : > { %s1562_s2 = sld [smem:[#allocation20_spill]] }
  0x5b   : > { %s955_s27 = scalar_lea.hbm %s1562_s2, 1024 }
  0x5c   : > { %p956_p6 = scmp.ne.s32.totalorder %s1562_s2, %s955_s27  ;;  %p962_p5 = scmp.lt.u32.totalorder %s955_s27, %s1562_s2 }
  0x5e   : > { %p958_p0 = pnand %p956_p6, %p1281_p12 }
  0x60   : > { %p959_p3 = pneg %p958_p0 }
  0x62   : > { %p964_p7 = pnand %p962_p5, %p959_p3 }
  0x64   : > { %967 = shalt.err (!%p964_p7)
}
  0x65   : > { %s968_s18 = scalar_lea.vmem %s206_s14, 1024  ;;  %p976_p1 = scmp.lt.s32.totalorder %s206_s14, %s206_s14 }
  0x66   : > { %p969_p9 = scmp.ne.s32.totalorder %s206_s14, %s968_s18  ;;  %p977_p4 = scmp.lt.s32.totalorder %s968_s18, %s968_s18 }
  0x68   : > { %p971_p11 = pnand %p969_p9, %p1281_p12  ;;  %p978_p8 = por %p977_p4, %p976_p1 }
  0x6a   : > { %p972_p13 = pneg %p971_p11 }
  0x6c   : > { %p979_p2 = pnand %p978_p8, %p972_p13 }
  0x6e   : > { %982 = shalt.err (!%p979_p2)
}
  0x6f   : > { %788 = dma.hbm_to_vmem [thread:$0]  (!%p1265_p10), %s1562_s2, 1024, %s206_s14, [#allocation6], %s1544_s16, %s1544_s16, %s1545_s17  }
  0x70   : > { %s1154_s22 = smov [#allocation10]   ;;  %s983_s11 = scalar_lea.hbm %s1535_s4, 16 }
  0x71   : > { %s230_s6 = sshll.u32 %s1154_s22, 4  ;;  %p984_p2 = scmp.ne.s32.totalorder %s1535_s4, %s983_s11  ;;  %s231_s6 = int_to_ptr.vmem [resolvable:$true] %s230_s6 }
  0x72   : > { %p990_p0 = scmp.lt.u32.totalorder %s983_s11, %s1535_s4 }
  0x73   : > { %p986_p8 = pnand %p984_p2, %p1281_p12 }
  0x75   : > { %p987_p6 = pneg %p986_p8 }
  0x77   : > { %p992_p3 = pnand %p990_p0, %p987_p6 }
  0x79   : > { %995 = shalt.err (!%p992_p3)
}
  0x7a   : > { %s996_s14 = scalar_lea.vmem %s231_s6, 16  ;;  %s1003_s12 = scalar_lea.vmem %s231_s6, 32 }
  0x7b   : > { %p997_p5 = scmp.ne.s32.totalorder %s231_s6, %s996_s14  ;;  %p1004_p11 = scmp.lt.s32.totalorder %s231_s6, %s231_s6 }
  0x7c   : > { %p1005_p13 = scmp.lt.s32.totalorder %s1003_s12, %s996_s14 }
  0x7d   : > { %p999_p7 = pnand %p997_p5, %p1281_p12 }
  0x7e   : > { %p1006_p1 = por %p1005_p13, %p1004_p11 }
  0x7f   : > { %p1000_p9 = pneg %p999_p7 }
  0x81   : > { %p1007_p4 = pnand %p1006_p1, %p1000_p9 }
  0x83   : > { %1010 = shalt.err (!%p1007_p4)
}
  0x84   : > { %794 = dma.hbm_to_vmem [thread:$0]  (!%p1265_p10), %s1535_s4, 16, %s231_s6, [#allocation9]  }
  0x85   : > { %s32_s8 = sadd.s32 1, %s1139_s23  ;;  %s35_s26 = sadd.s32 1, %s1143_s24 }
  0x86   : > { %p33_p12 = scmp.ge.s32.totalorder %s32_s8, 4  ;;  %s44_s10 = sadd.s32 1, %s1127_s20 }
  0x87   : > { %p51_p2 = scmp.ne.s32.totalorder %s1127_s20, %s1123_s19  ;;  %p52_p8 = scmp.eq.s32.totalorder %s1147_s25, 0 }
  0x88   : > { %s1585_s8 = smov (%p33_p12, %s32_s8), 0  ;;  %s1587_s26 = smov (!%p33_p12, %s35_s26), %s1143_s24 }
  0x89   : > { %s40_s27 = ssub.s32 %s1139_s23, %s1585_s8  ;;  %p1380_p6 = por %p52_p8, %p51_p2 }
  0x8a   : > { %p37_p10 = scmp.ge.s32.totalorder %s1587_s26, 2  ;;  %p1564_p0 = scmp.ne.s32.totalorder %s1553_s29, 0 }
  0x8b   : > { %p807_p5 = scmp.lt.s32.totalorder %s1147_s25, 8  ;;  %s241_s13 = sand.u32 1, %s1127_s20  }
  0x8c   : > { %p1386_p3 = por %p1564_p0, %p51_p2  ;;  %s1589_s26 = smov (%p37_p10, %s1587_s26), 0 }
  0x8d   : > { %s683_s15 = sshll.u32 %s241_s13, 3  ;;  %s39_s9 = ssub.s32 %s1143_s24, %s1589_s26 }
  0x8e   : > { %s41_s18 = sor.u32 %s40_s27, %s39_s9  ;;  %s684_s14 = sshll.u32 %s1139_s23, 1 }
  0x8f   : > { %p42_p7 = scmp.eq.s32.totalorder %s41_s18, 0  ;;  %s685_s12 = sshll.u32 %s1143_s24, 3 }
  0x90   : > { %s251_s5 = sadd.s32 %s685_s12, %s684_s14  ;;  %s245_s22 = scalar_lea.vmem [#allocation2], %s683_s15 }
  0x91   : > { %s254_s29 = sshll.u32 %s245_s22, 4  ;;  %s686_s17 = sshll.u32 %s251_s5, 6  ;;  %s1401_s29 = int_to_ptr.vmem [resolvable:$true] %s254_s29 }
  0x92   : > { %s1399_s16 = scalar_select %p42_p7, %s1127_s20, %s44_s10  }
  0x93   : > { %s1406_s3 = scalar_lea.hbm %s1531_s0, %s686_s17  ;;  %p1412_p9 = pnand %p807_p5, %p1380_p6 }
  0x94   : > { %s1416_s10 = scalar_lea.sflag [#allocation3], %s241_s13  ;;  %s1011_s15 = scalar_lea.hbm %s1406_s3, 128 }
  0x95   : > { %p1012_p11 = scmp.ne.s32.totalorder %s1406_s3, %s1011_s15  ;;  %p1013_p13 = pneg %p1412_p9 }
  0x96   : > { %s1016_s17 = scalar_lea.hbm %s1531_s0, 1024  ;;  %p1017_p12 = scmp.lt.u32.totalorder %s1406_s3, %s1531_s0 }
  0x97   : > { %p1014_p1 = pnand %p1013_p13, %p1012_p11  ;;  %p1018_p2 = scmp.lt.u32.totalorder %s1016_s17, %s1011_s15 }
  0x98   : > { %p1020_p6 = scmp.lt.u32.totalorder %s1011_s15, %s1406_s3 }
  0x99   : > { %p1015_p4 = pneg %p1014_p1  ;;  %p1019_p8 = por %p1018_p2, %p1017_p12 }
  0x9b   : > { %p1021_p10 = por %p1020_p6, %p1019_p8 }
  0x9d   : > { %p1022_p0 = pnand %p1021_p10, %p1015_p4 }
  0x9f   : > { %1025 = shalt.err (!%p1022_p0)
}
  0xa0   : > { %s1026_s13 = scalar_lea.vmem %s1401_s29, 128  ;;  %s1155_s18 = smov [#allocation2]  }
  0xa1   : > { %p1027_p5 = scmp.ne.s32.totalorder %s1401_s29, %s1026_s13  ;;  %s1031_s14 = sshll.u32 %s1155_s18, 4  ;;  %s1032_s14 = int_to_ptr.vmem [resolvable:$false] %s1031_s14 }
  0xa2   : > { %s1033_s12 = scalar_lea.vmem %s1032_s14, 256  ;;  %p1034_p1 = scmp.lt.s32.totalorder %s1401_s29, %s1032_s14 }
  0xa3   : > { %p1029_p7 = pnand %p1027_p5, %p1013_p13  ;;  %p1035_p12 = scmp.lt.s32.totalorder %s1033_s12, %s1026_s13 }
  0xa5   : > { %p1030_p11 = pneg %p1029_p7  ;;  %p1036_p2 = por %p1035_p12, %p1034_p1 }
  0xa7   : > { %p1037_p8 = pnand %p1036_p2, %p1030_p11 }
  0xa9   : > { %1040 = shalt.err (!%p1037_p8)
}
  0xaa   : > { %s1567_s5 = smov 4   ;;  %s1568_s22 = smov 64  }
  0xab   : > { %798 = dma.hbm_to_vmem [thread:$0]  (!%p1412_p9), %s1406_s3, 128, %s1401_s29, %s1416_s10, %s1568_s22, %s1568_s22, %s1567_s5  }
  0xac   : > { %p1569_p13 = scmp.ne.s32.totalorder %s1557_s7, 0 }
  0xad   : > { %s1450_s15 = sand.u32 (!%p1569_p13), 1, %s1123_s19   ;;  %p1570_p4 = scmp.ne.s32.totalorder (!%p1569_p13), %s1554_s30, 0 }
  0xae   : > { %266 = sbr.rel (%p1569_p13) target bundleno = 654 (0x28e), region = 40  ;;  %s688_s1 = sshll.u32 (!%p1569_p13), %s1450_s15, 3 }
  0xaf   : > { %s269_s2 = scalar_lea.sflag (!%p1569_p13), [#allocation3], %s1450_s15  ;;  %s272_s27 = scalar_lea.vmem (!%p1569_p13), [#allocation2], %s688_s1 }
  0xb5   : > { %1102 = dma.done.wait (%p1570_p4), %s269_s2, 128  }
  0xb6   : > { %1104 = vsyncadd (%p1570_p4), %s269_s2, 4294967168  ;;  %p1571_p9 = scmp.ne.s32.totalorder %s1552_s28, 0 }
  0xb8   : > { %1106 = dma.done.wait (%p1571_p9), [#allocation6], 1344  }
  0xb9   : > { %1108 = vsyncadd (%p1571_p9), [#allocation6], 4294965952 }
  0xba   : > { %1110 = dma.done.wait (%p1571_p9), [#allocation9], 32  }
  0xbb   : > { %1112 = vsyncadd (%p1571_p9), [#allocation9], 4294967264  ;;  %v1156_v0 = vmov 0.0   ;;  %vm1157_vm0 = vmmov 0   ;;  %v887_v1 = vld [vmem:[#allocation5] sm:$0xff]   ;;  %v888_v2 = vld [vmem:[#allocation5 + $0x8] sm:$0xff]  }
  0xbc   : > { %732 = vmatprep.subr.bf16.mxu0 %v1156_v0  ;;  %738 = vmatprep.mubr.msk.bf16.mxu0 %vm1157_vm0, %v1156_v0  ;;  %v889_v3 = vld [vmem:[#allocation5 + $0x10] ss:$0 sps:$4 sm:$0x33]   ;;  %vm349_vm1 = vcmask 1041408   ;;  %v891_v4 = vld [vmem:[#allocation7] sm:$0xff]   ;;  %v892_v5 = vld [vmem:[#allocation7 + $0x8] sm:$0xff]  }
  0xbd   : > { %742 = vmatprep.subr.bf16.mxu1 %v1156_v0  ;;  %758 = vmatprep.mubr.msk.bf16.mxu1 %vm1157_vm0, %v1156_v0  ;;  %v351_v6 = vsel %vm349_vm1, %v889_v3, 0  ;;  %v890_v7 = vld [vmem:[%s272_s27] sm:$0xff]   ;;  %vm345_vm2 = vcmask 293888   ;;  %v893_v8 = vld [vmem:[#allocation7 + $0x10] sm:$0xff]   ;;  %s1572_s3 = sld [smem:[#allocation17_spill]]  ;;  %s712_s28 = sshll.u32 %s1131_s21, 1 }
  0xbe   : > { %733 = vmatpush3.bf16.msra.mxu0 %v887_v1  ;;  %743 = vmatpush3.bf16.msra.mxu1 %v891_v4  ;;  %v894_v9 = vld [vmem:[#allocation7 + $0x18] sm:$0xff]   ;;  %v895_v10 = vld [vmem:[#allocation7 + $0x20] sm:$0xff]   ;;  %v896_v11 = vld [vmem:[#allocation7 + $0x28] sm:$0xff]   ;;  %s314_s10 = scalar_lea.vmem [#allocation11], %s688_s1  ;;  %vm528_vm3 = vcmask 60416   ;;  %s1573_s9 = sld [smem:[#allocation22_spill]] }
  0xbf   : > { %734 = vmatprep.subr.bf16.mxu0 %v1156_v0  ;;  %744 = vmatprep.subr.bf16.mxu1 %v1156_v0  ;;  %v897_v12 = vld [vmem:[#allocation7 + $0x30] sm:$0xff]   ;;  %v898_v13 = vld [vmem:[#allocation7 + $0x38] sm:$0xff]   ;;  %v707_v19 = vld [vmem:[#allocation8] ss:$0 sm:$0xff]  ;;  %s547_s17 = sshll.u32 %s314_s10, 4  ;;  %s532_s18 = scalar_lea.sflag [#allocation4], %s1450_s15  ;;  %s1477_s17 = int_to_ptr.vmem [resolvable:$true] %s547_s17 }
  0xc0   : > { %v708_v21 = vld [vmem:[#allocation10] ss:$0 sm:$0xff]  ;;  %s1041_s14 = scalar_lea.vmem %s1477_s17, 128  ;;  %s1158_s12 = smov [#allocation11]  }
  0xc1   : > { %p1042_p6 = scmp.ne.s32.totalorder %s1477_s17, %s1041_s14  ;;  %s1045_s5 = sshll.u32 %s1158_s12, 4  ;;  %s1046_s5 = int_to_ptr.vmem [resolvable:$false] %s1045_s5 }
  0xc2   : > { %735 = vmatpush3.bf16.msra.mxu0 %v888_v2  ;;  %745 = vmatpush3.bf16.msra.mxu1 %v892_v5  ;;  %s1047_s22 = scalar_lea.vmem %s1046_s5, 256  ;;  %p1048_p5 = scmp.lt.s32.totalorder %s1477_s17, %s1046_s5 }
  0xc3   : > { %736 = vmatprep.subr.bf16.mxu0 %v1156_v0  ;;  %746 = vmatprep.subr.bf16.mxu1 %v1156_v0  ;;  %s713_s30 = sshll.u32 %s1572_s3, 3  ;;  %p1043_p10 = pnand %p1042_p6, %p1386_p3 }
  0xc4   : > { %s544_s7 = sadd.s32 %s713_s30, %s712_s28  ;;  %p1049_p7 = scmp.lt.s32.totalorder %s1047_s22, %s1041_s14 }
  0xc5   : > { %s714_s29 = sshll.u32 %s544_s7, 6  ;;  %p1044_p0 = pneg %p1043_p10 }
  0xc6   : > { %737 = vmatpush3.bf16.msra.mxu0 %v351_v6  ;;  %747 = vmatpush3.bf16.msra.mxu1 %v893_v8  ;;  %s1475_s13 = scalar_lea.hbm %s1573_s9, %s714_s29  ;;  %p1050_p11 = por %p1049_p7, %p1048_p5 }
  0xc7   : > { %748 = vmatprep.subr.bf16.mxu1 %v1156_v0 }
  0xc8   : > { %p1051_p1 = pnand %p1050_p11, %p1044_p0 }
  0xc9   : > { %739 = vmatmul.mubr.msk.bf16.vlgmr.msra.gmra.mrb[0].mxu0 %vm345_vm2, %v890_v7 }
  0xca   : > { %749 = vmatpush3.bf16.msra.mxu1 %v894_v9 }
  0xcb   : > { %750 = vmatprep.subr.bf16.mxu1 %v1156_v0 }
  0xce   : > { %751 = vmatpush3.bf16.msra.mxu1 %v895_v10 }
  0xcf   : > { %752 = vmatprep.subr.bf16.mxu1 %v1156_v0 }
  0xd2   : > { %753 = vmatpush3.bf16.msra.mxu1 %v896_v11 }
  0xd3   : > { %754 = vmatprep.subr.bf16.mxu1 %v1156_v0 }
  0xd6   : > { %755 = vmatpush3.bf16.msra.mxu1 %v897_v12 }
  0xd7   : > { %756 = vmatprep.subr.bf16.mxu1 %v1156_v0 }
  0xda   : > { %757 = vmatpush3.bf16.msra.mxu1 %v898_v13 }
 0x19c   : > { %v387_v14 = vpop.f32.mrb[0].mxu0 }
 0x19d   : > { %v740_v15 = vpop.f32.mrb[1].mxu0 }
 0x19e   : > { %v390_v16 = vpop.f32.mrb[2].mxu0 }
 0x19f   : > { %v394_v17 = vpack.c.bf16 %v390_v16, %v387_v14  ;;  %v741_v18 = vpop.f32.mrb[3].mxu0 }
 0x1a1   : > { %759 = vmatmul.mubr.bf16.vlgmr.msra.gmra.mrb[0].mxu1 %v394_v17 }
 0x274   : > { %v493_v20 = vpop.f32.mrb[0].mxu1 }
 0x275   : > { %v507_v22 = vmul.f32 %v707_v19, %v493_v20  ;;  %v760_v23 = vpop.f32.mrb[1].mxu1 }
 0x276   : > { %v496_v24 = vpop.f32.mrb[2].mxu1 }
 0x277   : > { %v516_v25 = vadd.f32 %v708_v21, %v507_v22  ;;  %v508_v26 = vmul.f32 %v707_v19, %v496_v24  ;;  %v761_v27 = vpop.f32.mrb[3].mxu1 }
 0x279   : > { %v518_v28 = vmax.f32 %v516_v25, 0.0  ;;  %v517_v29 = vadd.f32 %v708_v21, %v508_v26 }
 0x27b   : > { %v717_v30 = vpack.c.bf16 %v518_v28, %v518_v28  ;;  %v519_v31 = vmax.f32 %v517_v29, 0.0 }
 0x27d   : > { %529 = vst.msk [vmem:[%s314_s10] sm:$0xf] %vm528_vm3, %v717_v30  ;;  %v718_v32 = vpack.c.bf16 %v519_v31, %v519_v31 }
 0x27f   : > { %530 = vst.msk [vmem:[%s314_s10 + $0x4] sm:$0xf] %vm528_vm3, %v718_v32 }
 0x280   : > { %1054 = shalt.err (!%p1051_p1)
}
 0x281   : > { %s1055_s1 = scalar_lea.hbm %s1475_s13, 128  ;;  %s1059_s3 = scalar_lea.hbm %s1573_s9, 1024 }
 0x282   : > { %p1056_p12 = scmp.ne.s32.totalorder %s1475_s13, %s1055_s1  ;;  %p1060_p13 = scmp.lt.u32.totalorder %s1475_s13, %s1573_s9 }
 0x283   : > { %p1061_p4 = scmp.lt.u32.totalorder %s1059_s3, %s1055_s1  ;;  %p1063_p6 = scmp.lt.u32.totalorder %s1055_s1, %s1475_s13 }
 0x284   : > { %p1057_p2 = pnand %p1056_p12, %p1386_p3 }
 0x285   : > { %p1062_p9 = por %p1061_p4, %p1060_p13 }
 0x286   : > { %p1058_p8 = pneg %p1057_p2 }
 0x287   : > { %p1064_p10 = por %p1063_p6, %p1062_p9 }
 0x289   : > { %p1065_p0 = pnand %p1064_p10, %p1058_p8 }
 0x28b   : > { %1068 = shalt.err (!%p1065_p0)
}
 0x28c   : > { %s1159_s7 = smov 64   ;;  %s1160_s29 = smov 4  }
 0x28d   : > { %780 = dma.vmem_to_hbm [thread:$0]  (%p1386_p3), %s1477_s17, 128, %s1475_s13, %s532_s18, %s1159_s7, %s1159_s7, %s1160_s29  }
 0x28e PF: > { %s1574_s10 = sld [smem:[#allocation16_spill]]  ;;  %s1575_s21 = sld [smem:[#allocation18_spill]] }
 0x28f   : > { %p812_p5 = scmp.ge.s32.totalorder %s1147_s25, 2 }
 0x294   : > { %s562_s11 = sand.u32 1, %s1574_s10   ;;  %p1576_p7 = scmp.ne.s32.totalorder %s1575_s21, 0 }
 0x295   : > { %s563_s14 = scalar_lea.sflag [#allocation4], %s562_s11 }
 0x296   : > { %p800_p11 = pnand %p812_p5, %p1576_p7 }
 0x298   : > { %1114 = dma.done.wait (!%p800_p11), %s563_s14, 128  }
 0x299   : > { %1116 = vsyncadd (!%p800_p11), %s563_s14, 4294967168  ;;  %s23_s25 = sadd.s32 1, %s1147_s25   ;;  %s1577_s18 = smov %s1123_s19 }
 0x29a   : > { %p20_p1 = scmp.ge.s32.totalorder %s23_s25, 10   ;;  %s1578_s19 = smov %s1127_s20 }
 0x29b   : > { %s1579_s20 = smov %s1399_s16  ;;  %s1580_s21 = smov %s1139_s23 }
 0x29c   : > { %s1581_s22 = smov %s1143_s24  ;;  %s1582_s23 = smov %s1585_s8 }
 0x29d   : > { %s1583_s24 = smov %s1589_s26  ;;  %22 = sbr.rel (!%p20_p1) target bundleno = 14 (0xe), region = 101 }
 0x2a4   :  { %568 = vsyncpa [#allocation3], 1 }
 0x2a5   :  { %570 = vsyncpa [#allocation3 + $0x1], 1 }
 0x2a6   :  { %571 = vsyncpa [#allocation6], 1 }
 0x2a7   :  { %572 = vsyncpa [#allocation9], 1 }
 0x2a8   :  { %573 = vsyncpa [#allocation4], 1 }
 0x2a9   :  { %575 = vsyncpa [#allocation4 + $0x1], 1 }

</bundles_post_ra>
